<compile_context>
chip_gen: v6e
topology: v6e:2x2x1
jax: 0.10.0
libtpu: 0.0.40
codegen_flags: <defaults>
</compile_context>

<pallas_src>
import functools

import jax
import jax.numpy as jnp
from jax.experimental import pallas as pl
from jax.experimental.pallas import tpu as pltpu

EPS = 1e-5
LANE = 128


def _round_up(n, m):
    return (n + m - 1) // m * m


def _pick_batch_tile(batch, requested=None):
    if requested is not None:
        return _round_up(requested, 8)
    # Multiples of 256 fill the v6e/v7x MXU M dim; clamp for small batches.
    return min(256, _round_up(batch, 8))


def _vmem_limit_bytes(block_bytes):
    """Scoped-VMEM budget: double-buffered blocks + headroom, capped by chip."""
    cap = 128 << 20
    try:
        cap = int(pltpu.get_tpu_info().vmem_capacity_bytes)
    except Exception:
        pass
    want = 2 * int(block_bytes) + (2 << 20)
    return int(max(16 << 20, min(want, (cap * 7) // 8)))


# --------------------------------------------------------------------------
# Kernels
# --------------------------------------------------------------------------
def _linear_bn_moments_kernel(*refs, fuse_prev_bn, mask_rows, matmul_dtype, tb,
                              n_rows):
    """One batch tile of: [BN(prev)+ReLU ->] Linear -> (raw h, per-tile moments)."""
    if fuse_prev_bn:
        x_ref, st_ref, w_ref, h_ref, pm_ref = refs
        # Previous layer's BN folded to one FMA (s, t precomputed) + ReLU.
        a = jnp.maximum(x_ref[...] * st_ref[0:1, :] + st_ref[1:2, :], 0.0)
    else:
        x_ref, w_ref, h_ref, pm_ref = refs
        a = x_ref[...]

    if mask_rows:
        # Zero out batch-padding rows so they contribute nothing to this
        # matmul or its moments (layer-1 padding rows are already exactly 0).
        row = (jax.lax.broadcasted_iota(jnp.int32, (tb, 1), 0)
               + pl.program_id(0) * tb)
        a = jnp.where(row < n_rows, a, 0.0)

    h = jnp.dot(a.astype(matmul_dtype), w_ref[...],
                preferred_element_type=jnp.float32)
    h_ref[...] = h

    # Per-tile BN moment partials: row 0 = sum, row 1 = sum of squares (f32).
    s0 = jnp.sum(h, axis=0, keepdims=True)
    s1 = jnp.sum(h * h, axis=0, keepdims=True)
    pm_ref[...] = jnp.concatenate([s0, s1], axis=0)[None]


def _bn_apply_kernel(h_ref, st_ref, o_ref):
    """Final BatchNorm as a single folded scale/shift FMA (no ReLU)."""
    o_ref[...] = (h_ref[...] * st_ref[0:1, :] + st_ref[1:2, :]).astype(o_ref.dtype)


# --------------------------------------------------------------------------
# pallas_call builders
# --------------------------------------------------------------------------
def _linear_bn_moments(x, w, st, *, tb, n_rows):
    bp, fin = x.shape
    fout = w.shape[1]
    nt = bp // tb
    fuse = st is not None
    mask_rows = fuse and (n_rows != bp)

    args = [x]
    in_specs = [pl.BlockSpec((tb, fin), lambda i: (i, 0))]
    if fuse:
        args.append(st)
        in_specs.append(pl.BlockSpec((2, fin), lambda i: (0, 0)))
    args.append(w)
    # Constant index_map -> weights DMA'd once and kept VMEM-resident.
    in_specs.append(pl.BlockSpec((fin, fout), lambda i: (0, 0)))

    out_shape = (jax.ShapeDtypeStruct((bp, fout), jnp.float32),
                 jax.ShapeDtypeStruct((nt, 2, fout), jnp.float32))
    out_specs = (pl.BlockSpec((tb, fout), lambda i: (i, 0)),
                 pl.BlockSpec((1, 2, fout), lambda i: (i, 0, 0)))

    block_bytes = (tb * fin * x.dtype.itemsize
                   + (2 * fin * 4 if fuse else 0)
                   + fin * fout * w.dtype.itemsize
                   + tb * fout * 4
                   + 2 * fout * 4)

    return pl.pallas_call(
        functools.partial(_linear_bn_moments_kernel, fuse_prev_bn=fuse,
                          mask_rows=mask_rows, matmul_dtype=w.dtype, tb=tb,
                          n_rows=n_rows),
        grid=(nt,),
        in_specs=in_specs,
        out_specs=out_specs,
        out_shape=out_shape,
        compiler_params=pltpu.CompilerParams(
            dimension_semantics=("parallel",),
            vmem_limit_bytes=_vmem_limit_bytes(block_bytes)),
    )(*args)


def _bn_apply(h, st, *, tb):
    bp, f = h.shape
    nt = bp // tb
    block_bytes = 2 * tb * f * 4 + 2 * f * 4
    return pl.pallas_call(
        _bn_apply_kernel,
        grid=(nt,),
        in_specs=[pl.BlockSpec((tb, f), lambda i: (i, 0)),
                  pl.BlockSpec((2, f), lambda i: (0, 0))],
        out_specs=pl.BlockSpec((tb, f), lambda i: (i, 0)),
        out_shape=jax.ShapeDtypeStruct((bp, f), jnp.float32),
        compiler_params=pltpu.CompilerParams(
            dimension_semantics=("parallel",),
            vmem_limit_bytes=_vmem_limit_bytes(block_bytes)),
    )(h, st)


def _fold_bn(pm, gb, n_rows):
    """Reduce per-tile (sum, sumsq) partials -> folded BN (scale, shift), (2,F)."""
    tot = jnp.sum(pm, axis=0)                                   # (2, F) f32
    mean = tot[0] / n_rows
    var = jnp.maximum(tot[1] / n_rows - mean * mean, 0.0)
    s = gb[0] * jax.lax.rsqrt(var + EPS)
    t = gb[1] - mean * s
    return jnp.stack([s, t], axis=0)                            # (2, F) f32


# --------------------------------------------------------------------------
# Parameter prep (one-time, out of the hot path) and forward
# --------------------------------------------------------------------------
def prepare_params(params, matmul_dtype=jnp.bfloat16):
    """Pad feature dims to 128 lanes, cast weights to the MXU dtype, pack
    (gamma, beta) per layer. Linear biases are dropped: a per-feature bias
    immediately before training-mode BN is exactly cancelled by the mean."""
    (w1, b1, g1, be1, w2, b2, g2, be2, w3, b3, g3, be3) = params
    del b1, b2, b3

    dim, hidden = w1.shape
    proj = w3.shape[1]
    dp, hp, pp = (_round_up(n, LANE) for n in (dim, hidden, proj))

    w1p = jnp.pad(w1, ((0, dp - dim), (0, hp - hidden))).astype(matmul_dtype)
    w2p = jnp.pad(w2, ((0, hp - hidden), (0, hp - hidden))).astype(matmul_dtype)
    w3p = jnp.pad(w3, ((0, hp - hidden), (0, pp - proj))).astype(matmul_dtype)

    def pack_gb(g, beta, n):
        f = g.shape[-1]
        gp = jnp.pad(g, ((0, 0), (0, n - f)), constant_values=1.0)
        bp_ = jnp.pad(beta, ((0, 0), (0, n - f)))
        return jnp.concatenate([gp, bp_], axis=0).astype(jnp.float32)  # (2, n)

    return ((w1p, w2p, w3p),
            (pack_gb(g1, be1, hp), pack_gb(g2, be2, hp), pack_gb(g3, be3, pp)))


def mlp_forward(x, prepped, *, out_dim, batch_tile=None):
    """MLP forward. x: (B, dim) f32 -> (B, out_dim) f32."""
    (w1p, w2p, w3p), (gb1, gb2, gb3) = prepped
    matmul_dtype = w1p.dtype
    b, d = x.shape
    dp = w1p.shape[0]

    tb = _pick_batch_tile(b, batch_tile)
    bp = _round_up(b, tb)

    # Lane-dense, batch-tile-aligned input; zero padding keeps layer-1 moments
    # exact (padded rows produce h == 0 since biases were folded away).
    xp = jnp.pad(x, ((0, bp - b), (0, dp - d))).astype(matmul_dtype)

    h1, pm1 = _linear_bn_moments(xp, w1p, None, tb=tb, n_rows=b)
    st1 = _fold_bn(pm1, gb1, b)
    h2, pm2 = _linear_bn_moments(h1, w2p, st1, tb=tb, n_rows=b)
    st2 = _fold_bn(pm2, gb2, b)
    h3, pm3 = _linear_bn_moments(h2, w3p, st2, tb=tb, n_rows=b)
    st3 = _fold_bn(pm3, gb3, b)
    out = _bn_apply(h3, st3, tb=tb)
    return out[:b, :out_dim]


# --------------------------------------------------------------------------
# Reference + test harness
# --------------------------------------------------------------------------
def init_params(key, dim, hidden, proj):
    """PyTorch-style Linear init (uniform +/- 1/sqrt(fan_in)), weights stored
    (in, out). BN gamma/beta randomized so the affine BN path is exercised."""
    ks = jax.random.split(key, 12)

    def linear(kw, kb, fan_in, fan_out):
        bound = 1.0 / jnp.sqrt(fan_in)
        w = jax.random.uniform(kw, (fan_in, fan_out), jnp.float32, -bound, bound)
        bias = jax.random.uniform(kb, (1, fan_out), jnp.float32, -bound, bound)
        return w, bias

    def bn_affine(kg, kb, f):
        g = jax.random.uniform(kg, (1, f), jnp.float32, 0.5, 1.5)
        be = 0.1 * jax.random.normal(kb, (1, f), jnp.float32)
        return g, be

    w1, b1 = linear(ks[0], ks[1], dim, hidden)
    w2, b2 = linear(ks[2], ks[3], hidden, hidden)
    w3, b3 = linear(ks[4], ks[5], hidden, proj)
    g1, be1 = bn_affine(ks[6], ks[7], hidden)
    g2, be2 = bn_affine(ks[8], ks[9], hidden)
    g3, be3 = bn_affine(ks[10], ks[11], proj)
    return (w1, b1, g1, be1, w2, b2, g2, be2, w3, b3, g3, be3)


def mlp_reference(x, params):
    """PyTorch-faithful pure-JAX reference (f32, biases, two-pass variance BN)."""
    (w1, b1, g1, be1, w2, b2, g2, be2, w3, b3, g3, be3) = params

    def bn(h, g, be):
        mu = jnp.mean(h, axis=0, keepdims=True)
        var = jnp.mean((h - mu) ** 2, axis=0, keepdims=True)
        return (h - mu) / jnp.sqrt(var + EPS) * g + be

    h = jnp.maximum(bn(x @ w1 + b1, g1, be1), 0.0)
    h = jnp.maximum(bn(h @ w2 + b2, g2, be2), 0.0)
    return bn(h @ w3 + b3, g3, be3)


if __name__ == "__main__":
    # Small, module-consistent shapes: MLP(dim=32, projection_size=16, hidden=64).
    # B=40 is deliberately NOT a multiple of the small batch tile so the
    # cross-tile BN-moment reduction and padded-row masking paths are exercised.
    B, DIM, HIDDEN, PROJ = 40, 32, 64, 16

    key = jax.random.PRNGKey(0)
    k_x, k_p = jax.random.split(key)
    x = jax.random.normal(k_x, (B, DIM), jnp.float32)
    params = init_params(k_p, DIM, HIDDEN, PROJ)
    ref = mlp_reference(x, params)

    # f32-matmul path, forced small batch tile (3 tiles + padded rows): tight check.
    prep_f32 = prepare_params(params, jnp.float32)
    fwd_f32 = jax.jit(functools.partial(mlp_forward, out_dim=PROJ, batch_tile=16))
    out_f32 = jax.block_until_ready(fwd_f32(x, prep_f32))
    assert out_f32.shape == (B, PROJ)
    assert jnp.allclose(out_f32, ref, atol=1e-3, rtol=1e-3), \
        "f32 path mismatch vs reference"

    # bf16-matmul path (default tile choice; the v6e/v7x fast path).
    prep_bf16 = prepare_params(params, jnp.bfloat16)
    fwd_bf16 = jax.jit(functools.partial(mlp_forward, out_dim=PROJ))
    out_bf16 = jax.block_until_ready(fwd_bf16(x, prep_bf16))
    assert out_bf16.shape == (B, PROJ)
    assert jnp.allclose(out_bf16, ref, atol=1e-1, rtol=1e-1), \
        "bf16 path mismatch vs reference"

    print("KERNEL_OK")
</pallas_src>

<mosaic_0001>
module attributes {stable_mosaic.version = 11 : i64} {
  func.func @_linear_bn_moments_kernel(%arg0: i32, %arg1: memref<16x128xf32, #tpu.memory_space<vmem>>, %arg2: memref<128x128xf32, #tpu.memory_space<vmem>>, %arg3: memref<16x128xf32, #tpu.memory_space<vmem>>, %arg4: memref<1x2x128xf32, #tpu.memory_space<vmem>>) attributes {dimension_semantics = [#tpu.dimension_semantics<parallel>], iteration_bounds = array<i64: 3>, scalar_prefetch = 0 : i64, scratch_operands = 0 : i64, tpu.core_type = #tpu.core_type<tc>, window_params = [{transform_indices = @transform_0, window_bounds = array<i64: 16, 128>}, {pipeline_mode = #tpu.pipeline_mode<synchronous>, transform_indices = @transform_1, window_bounds = array<i64: 128, 128>}, {transform_indices = @transform_2, window_bounds = array<i64: 16, 128>}, {transform_indices = @transform_3, window_bounds = array<i64: 1, 2, 128>}]} {
    %c0 = arith.constant 0 : index
    %c0_0 = arith.constant 0 : index
    %0 = vector.load %arg1[%c0, %c0_0] : memref<16x128xf32, #tpu.memory_space<vmem>>, vector<16x128xf32>
    %c0_1 = arith.constant 0 : index
    %c0_2 = arith.constant 0 : index
    %1 = vector.load %arg2[%c0_1, %c0_2] : memref<128x128xf32, #tpu.memory_space<vmem>>, vector<128x128xf32>
    %cst = arith.constant dense<0.000000e+00> : vector<16x128xf32>
    %2 = tpu.matmul %0, %1, %cst {dimension_numbers = #tpu.dot_dimension_numbers<[1], [0], [0], [1], [0, 0, 1, 1], [], []>} : vector<16x128xf32>, vector<128x128xf32>, vector<16x128xf32> -> vector<16x128xf32>
    %c0_3 = arith.constant 0 : index
    %c0_4 = arith.constant 0 : index
    %3 = vector.load %arg3[%c0_3, %c0_4] : memref<16x128xf32, #tpu.memory_space<vmem>>, vector<16x128xf32>
    tpu.vector_store %arg3[%c0_3, %c0_4], %2 {strides = array<i32>} : memref<16x128xf32, #tpu.memory_space<vmem>>, vector<16x128xf32>,
    %cst_5 = arith.constant dense<0.000000e+00> : vector<128xf32>
    %4 = vector.multi_reduction <add>, %2, %cst_5 [0] : vector<16x128xf32> to vector<128xf32>
    %5 = vector.shape_cast %4 : vector<128xf32> to vector<1x128xf32>
    %6 = arith.mulf %2, %2 : vector<16x128xf32>
    %cst_6 = arith.constant dense<0.000000e+00> : vector<128xf32>
    %7 = vector.multi_reduction <add>, %6, %cst_6 [0] : vector<16x128xf32> to vector<128xf32>
    %8 = vector.shape_cast %7 : vector<128xf32> to vector<1x128xf32>
    %9 = tpu.concatenate %5, %8 in 0 : vector<1x128xf32>, vector<1x128xf32> -> vector<2x128xf32>
    %10 = vector.shape_cast %9 : vector<2x128xf32> to vector<1x2x128xf32>
    %c0_7 = arith.constant 0 : index
    %c0_8 = arith.constant 0 : index
    %c0_9 = arith.constant 0 : index
    %11 = vector.load %arg4[%c0_7, %c0_8, %c0_9] : memref<1x2x128xf32, #tpu.memory_space<vmem>>, vector<1x2x128xf32>
    tpu.vector_store %arg4[%c0_7, %c0_8, %c0_9], %10 {strides = array<i32>} : memref<1x2x128xf32, #tpu.memory_space<vmem>>, vector<1x2x128xf32>,
    return
  }
  func.func @transform_0(%arg0: i32) -> (i32, i32) {
    %c0_i32 = arith.constant 0 : i32
    %c0_i32_0 = arith.constant 0 : i32
    return %arg0, %c0_i32 : i32, i32
  }
  func.func @transform_1(%arg0: i32) -> (i32, i32) {
    %c0_i32 = arith.constant 0 : i32
    %c0_i32_0 = arith.constant 0 : i32
    %c0_i32_1 = arith.constant 0 : i32
    return %c0_i32, %c0_i32_0 : i32, i32
  }
  func.func @transform_2(%arg0: i32) -> (i32, i32) {
    %c0_i32 = arith.constant 0 : i32
    %c0_i32_0 = arith.constant 0 : i32
    return %arg0, %c0_i32 : i32, i32
  }
  func.func @transform_3(%arg0: i32) -> (i32, i32, i32) {
    %c0_i32 = arith.constant 0 : i32
    %c0_i32_0 = arith.constant 0 : i32
    %c0_i32_1 = arith.constant 0 : i32
    return %arg0, %c0_i32, %c0_i32_0 : i32, i32, i32
  }
}

module attributes {stable_mosaic.version = 11 : i64} {
  func.func @_linear_bn_moments_kernel(%arg0: i32, %arg1: memref<16x128xf32, #tpu.memory_space<vmem>>, %arg2: memref<2x128xf32, #tpu.memory_space<vmem>>, %arg3: memref<128x128xf32, #tpu.memory_space<vmem>>, %arg4: memref<16x128xf32, #tpu.memory_space<vmem>>, %arg5: memref<1x2x128xf32, #tpu.memory_space<vmem>>) attributes {dimension_semantics = [#tpu.dimension_semantics<parallel>], iteration_bounds = array<i64: 3>, scalar_prefetch = 0 : i64, scratch_operands = 0 : i64, tpu.core_type = #tpu.core_type<tc>, window_params = [{transform_indices = @transform_0, window_bounds = array<i64: 16, 128>}, {pipeline_mode = #tpu.pipeline_mode<synchronous>, transform_indices = @transform_1, window_bounds = array<i64: 2, 128>}, {pipeline_mode = #tpu.pipeline_mode<synchronous>, transform_indices = @transform_2, window_bounds = array<i64: 128, 128>}, {transform_indices = @transform_3, window_bounds = array<i64: 16, 128>}, {transform_indices = @transform_4, window_bounds = array<i64: 1, 2, 128>}]} {
    %c0 = arith.constant 0 : index
    %c0_0 = arith.constant 0 : index
    %0 = vector.load %arg1[%c0, %c0_0] : memref<16x128xf32, #tpu.memory_space<vmem>>, vector<16x128xf32>
    %c0_1 = arith.constant 0 : index
    %c0_2 = arith.constant 0 : index
    %1 = vector.load %arg2[%c0_1, %c0_2] : memref<2x128xf32, #tpu.memory_space<vmem>>, vector<1x128xf32>
    %2 = vector.broadcast %1 : vector<1x128xf32> to vector<16x128xf32>
    %3 = arith.mulf %0, %2 : vector<16x128xf32>
    %c1 = arith.constant 1 : index
    %c0_3 = arith.constant 0 : index
    %4 = vector.load %arg2[%c1, %c0_3] : memref<2x128xf32, #tpu.memory_space<vmem>>, vector<1x128xf32>
    %5 = vector.broadcast %4 : vector<1x128xf32> to vector<16x128xf32>
    %6 = arith.addf %3, %5 : vector<16x128xf32>
    %cst = arith.constant 0.000000e+00 : f32
    %7 = vector.broadcast %cst : f32 to vector<16x128xf32>
    %8 = arith.maximumf %6, %7 : vector<16x128xf32>
    %9 = tpu.iota {dimensions = array<i32: 0>} : vector<16x1xi32>
    %c16_i32 = arith.constant 16 : i32
    %10 = arith.muli %arg0, %c16_i32 : i32
    %11 = vector.broadcast %10 : i32 to vector<16x1xi32>
    %12 = arith.addi %9, %11 : vector<16x1xi32>
    %c40_i32 = arith.constant 40 : i32
    %13 = vector.broadcast %c40_i32 : i32 to vector<16x1xi32>
    %14 = arith.cmpi slt, %12, %13 : vector<16x1xi32>
    %cst_4 = arith.constant 0.000000e+00 : f32
    %15 = vector.shape_cast %14 : vector<16x1xi1> to vector<16x1xi1>
    %16 = vector.broadcast %15 : vector<16x1xi1> to vector<16x128xi1>
    %17 = vector.broadcast %cst_4 : f32 to vector<16x128xf32>
    %18 = arith.select %16, %8, %17 : vector<16x128xi1>, vector<16x128xf32>
    %c0_5 = arith.constant 0 : index
    %c0_6 = arith.constant 0 : index
    %19 = vector.load %arg3[%c0_5, %c0_6] : memref<128x128xf32, #tpu.memory_space<vmem>>, vector<128x128xf32>
    %cst_7 = arith.constant dense<0.000000e+00> : vector<16x128xf32>
    %20 = tpu.matmul %18, %19, %cst_7 {dimension_numbers = #tpu.dot_dimension_numbers<[1], [0], [0], [1], [0, 0, 1, 1], [], []>} : vector<16x128xf32>, vector<128x128xf32>, vector<16x128xf32> -> vector<16x128xf32>
    %c0_8 = arith.constant 0 : index
    %c0_9 = arith.constant 0 : index
    %21 = vector.load %arg4[%c0_8, %c0_9] : memref<16x128xf32, #tpu.memory_space<vmem>>, vector<16x128xf32>
    tpu.vector_store %arg4[%c0_8, %c0_9], %20 {strides = array<i32>} : memref<16x128xf32, #tpu.memory_space<vmem>>, vector<16x128xf32>,
    %cst_10 = arith.constant dense<0.000000e+00> : vector<128xf32>
    %22 = vector.multi_reduction <add>, %20, %cst_10 [0] : vector<16x128xf32> to vector<128xf32>
    %23 = vector.shape_cast %22 : vector<128xf32> to vector<1x128xf32>
    %24 = arith.mulf %20, %20 : vector<16x128xf32>
    %cst_11 = arith.constant dense<0.000000e+00> : vector<128xf32>
    %25 = vector.multi_reduction <add>, %24, %cst_11 [0] : vector<16x128xf32> to vector<128xf32>
    %26 = vector.shape_cast %25 : vector<128xf32> to vector<1x128xf32>
    %27 = tpu.concatenate %23, %26 in 0 : vector<1x128xf32>, vector<1x128xf32> -> vector<2x128xf32>
    %28 = vector.shape_cast %27 : vector<2x128xf32> to vector<1x2x128xf32>
    %c0_12 = arith.constant 0 : index
    %c0_13 = arith.constant 0 : index
    %c0_14 = arith.constant 0 : index
    %29 = vector.load %arg5[%c0_12, %c0_13, %c0_14] : memref<1x2x128xf32, #tpu.memory_space<vmem>>, vector<1x2x128xf32>
    tpu.vector_store %arg5[%c0_12, %c0_13, %c0_14], %28 {strides = array<i32>} : memref<1x2x128xf32, #tpu.memory_space<vmem>>, vector<1x2x128xf32>,
    return
  }
  func.func @transform_0(%arg0: i32) -> (i32, i32) {
    %c0_i32 = arith.constant 0 : i32
    %c0_i32_0 = arith.constant 0 : i32
    return %arg0, %c0_i32 : i32, i32
  }
  func.func @transform_1(%arg0: i32) -> (i32, i32) {
    %c0_i32 = arith.constant 0 : i32
    %c0_i32_0 = arith.constant 0 : i32
    %c0_i32_1 = arith.constant 0 : i32
    return %c0_i32, %c0_i32_0 : i32, i32
  }
  func.func @transform_2(%arg0: i32) -> (i32, i32) {
    %c0_i32 = arith.constant 0 : i32
    %c0_i32_0 = arith.constant 0 : i32
    %c0_i32_1 = arith.constant 0 : i32
    return %c0_i32, %c0_i32_0 : i32, i32
  }
  func.func @transform_3(%arg0: i32) -> (i32, i32) {
    %c0_i32 = arith.constant 0 : i32
    %c0_i32_0 = arith.constant 0 : i32
    return %arg0, %c0_i32 : i32, i32
  }
  func.func @transform_4(%arg0: i32) -> (i32, i32, i32) {
    %c0_i32 = arith.constant 0 : i32
    %c0_i32_0 = arith.constant 0 : i32
    %c0_i32_1 = arith.constant 0 : i32
    return %arg0, %c0_i32, %c0_i32_0 : i32, i32, i32
  }
}

module attributes {stable_mosaic.version = 11 : i64} {
  func.func @_bn_apply_kernel(%arg0: i32, %arg1: memref<16x128xf32, #tpu.memory_space<vmem>>, %arg2: memref<2x128xf32, #tpu.memory_space<vmem>>, %arg3: memref<16x128xf32, #tpu.memory_space<vmem>>) attributes {dimension_semantics = [#tpu.dimension_semantics<parallel>], iteration_bounds = array<i64: 3>, scalar_prefetch = 0 : i64, scratch_operands = 0 : i64, tpu.core_type = #tpu.core_type<tc>, window_params = [{transform_indices = @transform_0, window_bounds = array<i64: 16, 128>}, {pipeline_mode = #tpu.pipeline_mode<synchronous>, transform_indices = @transform_1, window_bounds = array<i64: 2, 128>}, {transform_indices = @transform_2, window_bounds = array<i64: 16, 128>}]} {
    %c0 = arith.constant 0 : index
    %c0_0 = arith.constant 0 : index
    %0 = vector.load %arg1[%c0, %c0_0] : memref<16x128xf32, #tpu.memory_space<vmem>>, vector<16x128xf32>
    %c0_1 = arith.constant 0 : index
    %c0_2 = arith.constant 0 : index
    %1 = vector.load %arg2[%c0_1, %c0_2] : memref<2x128xf32, #tpu.memory_space<vmem>>, vector<1x128xf32>
    %2 = vector.broadcast %1 : vector<1x128xf32> to vector<16x128xf32>
    %3 = arith.mulf %0, %2 : vector<16x128xf32>
    %c1 = arith.constant 1 : index
    %c0_3 = arith.constant 0 : index
    %4 = vector.load %arg2[%c1, %c0_3] : memref<2x128xf32, #tpu.memory_space<vmem>>, vector<1x128xf32>
    %5 = vector.broadcast %4 : vector<1x128xf32> to vector<16x128xf32>
    %6 = arith.addf %3, %5 : vector<16x128xf32>
    %c0_4 = arith.constant 0 : index
    %c0_5 = arith.constant 0 : index
    %7 = vector.load %arg3[%c0_4, %c0_5] : memref<16x128xf32, #tpu.memory_space<vmem>>, vector<16x128xf32>
    tpu.vector_store %arg3[%c0_4, %c0_5], %6 {strides = array<i32>} : memref<16x128xf32, #tpu.memory_space<vmem>>, vector<16x128xf32>,
    return
  }
  func.func @transform_0(%arg0: i32) -> (i32, i32) {
    %c0_i32 = arith.constant 0 : i32
    %c0_i32_0 = arith.constant 0 : i32
    return %arg0, %c0_i32 : i32, i32
  }
  func.func @transform_1(%arg0: i32) -> (i32, i32) {
    %c0_i32 = arith.constant 0 : i32
    %c0_i32_0 = arith.constant 0 : i32
    %c0_i32_1 = arith.constant 0 : i32
    return %c0_i32, %c0_i32_0 : i32, i32
  }
  func.func @transform_2(%arg0: i32) -> (i32, i32) {
    %c0_i32 = arith.constant 0 : i32
    %c0_i32_0 = arith.constant 0 : i32
    return %arg0, %c0_i32 : i32, i32
  }
}

</mosaic_0001>

<bundles_post_ra>
// kernel: mlp_forward.7
= control target key start
LH: loop header
LB: loop body
LE: loop exit
PB: predicated region body
PF: predicated region fallthrough
CT: control target
= control target key end

     0   :  { %s246_s9 = smov 0   ;;  %s277_s0 = inlined_call_operand.vmem [shape: f32[48,128], index: 0, kind: input, shape index: {}]   ;;  %s278_s1 = inlined_call_operand.vmem [shape: f32[2,128], index: 1, kind: input, shape index: {}]   ;;  %s279_s2 = inlined_call_operand.vmem [shape: f32[48,128], index: 2, kind: output, shape index: {}]  }
   0x1 LB: > { %s221_s10 = sadd.s32 4294967295, %s248_s9   ;;  %p225_p0 = scmp.ge.s32.totalorder %s248_s9, 1  ;;  %s248_s9 = sphi %s246_s9, %s12_s9  }
   0x2   : > { %p113_p1 = scmp.lt.s32.totalorder %s248_s9, 4 }
   0x4   : > { %p114_p2 = pnand %p225_p0, %p113_p1 }
   0x5   : > { %s226_s11 = sshll.u32 (!%p114_p2), %s221_s10, 1 }
   0x6   : > { %117 = sbr.rel (%p114_p2) target bundleno = 20 (0x14), region = 28  ;;  %p136_p3 = scmp.lt.s32.totalorder (!%p114_p2), %s226_s11, 5 }
   0xb   : > { %s281_s11 = smov (!%p136_p3, %s226_s11), 5  ;;  %v230_v0 = vld [vmem:[%s278_s1] ss:$0 sm:$0xff]  ;;  %v231_v3 = vld [vmem:[%s278_s1 + $0x1] ss:$0 sm:$0xff] }
   0xc   : > { %s227_s12 = sshll.u32 %s281_s11, 3 }
   0xd   : > { %s139_s17 = scalar_lea.vmem %s277_s0, %s227_s12  ;;  %s145_s22 = scalar_lea.vmem %s279_s2, %s227_s12 }
   0xe   : > { %v147_v1 = vld [vmem:[%s139_s17] sm:$0xff]  ;;  %v148_v2 = vld [vmem:[%s139_s17 + $0x8] sm:$0xff] }
   0xf   : > { %v154_v4 = vmul.f32 %v230_v0, %v147_v1  ;;  %v155_v5 = vmul.f32 %v230_v0, %v148_v2 }
  0x11   : > { %v161_v6 = vadd.f32 %v231_v3, %v154_v4  ;;  %v162_v7 = vadd.f32 %v231_v3, %v155_v5 }
  0x13   : > { %163 = vst [vmem:[%s145_s22] sm:$0xff] %v161_v6  ;;  %164 = vst [vmem:[%s145_s22 + $0x8] sm:$0xff] %v162_v7 }
  0x14 PF: > { %s12_s9 = sadd.s32 1, %s248_s9  }
  0x15   : > { %p9_p4 = scmp.ge.s32.totalorder %s12_s9, 5  }
  0x17   :  { %11 = sbr.rel (!%p9_p4) target bundleno = 1 (0x1), region = 58 }

// kernel: mlp_forward.5
= control target key start
LH: loop header
LB: loop body
LE: loop exit
PB: predicated region body
PF: predicated region fallthrough
CT: control target
= control target key end

     0   :  { %s555_s15 = smov 0   ;;  %s642_s0 = inlined_call_operand.vmem [shape: f32[48,128], index: 0, kind: input, shape index: {}]   ;;  %s643_s1 = inlined_call_operand.vmem [shape: f32[2,128], index: 1, kind: input, shape index: {}]   ;;  %s644_s2 = inlined_call_operand.vmem [shape: f32[128,128], index: 2, kind: input, shape index: {}]   ;;  %s645_s3 = inlined_call_operand.vmem [shape: f32[48,128], index: 3, kind: output, shape index: {0}]   ;;  %s646_s4 = inlined_call_operand.vmem [shape: f32[3,2,128], index: 4, kind: output, shape index: {1}]  }
   0x1 LB: > { %s561_s16 = sadd.s32 4294967295, %s528_s15   ;;  %p448_p0 = scmp.ge.s32.totalorder %s528_s15, 1  ;;  %s528_s15 = sphi %s555_s15, %s15_s15  }
   0x2   : > { %p166_p1 = scmp.lt.s32.totalorder %s528_s15, 4 }
   0x4   : > { %p167_p2 = pnand %p448_p0, %p166_p1 }
   0x5   : > { %s449_s21 = sshll.u32 (!%p167_p2), %s561_s16, 1  ;;  %s456_s22 = sshll.u32 (!%p167_p2), %s561_s16, 4 }
   0x6   : > { %170 = sbr.rel (%p167_p2) target bundleno = 257 (0x101), region = 32  ;;  %p197_p3 = scmp.lt.s32.totalorder (!%p167_p2), %s449_s21, 5 }
   0x7   : > { %p208_p4 = scmp.lt.s32.totalorder (!%p167_p2), %s561_s16, 2 }
   0xb   : > { %v260_v0 = vld [vmem:[%s644_s2 + $0x78] sm:$0xff]  ;;  %v259_v1 = vld [vmem:[%s644_s2 + $0x70] sm:$0xff]  ;;  %v230_v2 = vlaneseq  ;;  %v258_v3 = vld [vmem:[%s644_s2 + $0x68] sm:$0xff]  ;;  %s648_s21 = smov (!%p197_p3, %s449_s21), 5  ;;  %v234_v6 = vstv %s456_s22  ;;  %s650_s16 = smov (!%p208_p4, %s561_s16), 2  ;;  %vm354_vm2 = vcmask 1040384  }
   0xc   : > { %479 = vmatprep.subr.mxu0 %v260_v0  ;;  %v257_v5 = vld [vmem:[%s644_s2 + $0x60] sm:$0xff]  ;;  %s450_s27 = sshll.u32 %s648_s21, 3  ;;  %v256_v8 = vld [vmem:[%s644_s2 + $0x58] sm:$0xff]  ;;  %v255_v12 = vld [vmem:[%s644_s2 + $0x50] sm:$0xff]  ;;  %s453_s21 = sshll.u32 %s650_s16, 1 }
   0xd   : > { %480 = vmatpush3.msra.mxu0 %v260_v0  ;;  %v231_v4 = vshrl.u32 %v230_v2, 7  ;;  %v454_v7 = vld [vmem:[%s643_s1] ss:$0 sm:$0xff]  ;;  %s200_s8 = scalar_lea.vmem %s642_s0, %s450_s27  ;;  %v455_v10 = vld [vmem:[%s643_s1 + $0x1] ss:$0 sm:$0xff]  ;;  %v254_v14 = vld [vmem:[%s644_s2 + $0x48] sm:$0xff]  ;;  %s206_s13 = scalar_lea.vmem %s645_s3, %s450_s27 }
   0xe   : > { %481 = vmatprep.subr.mxu0 %v259_v1  ;;  %v212_v9 = vld [vmem:[%s200_s8] sm:$0xff]  ;;  %v252_v18 = vld [vmem:[%s644_s2 + $0x38] sm:$0xff]  ;;  %v251_v19 = vld [vmem:[%s644_s2 + $0x30] sm:$0xff]  ;;  %s211_s17 = scalar_lea.vmem %s646_s4, %s453_s21 }
   0xf   : > { %482 = vmatpush3.msra.mxu0 %v259_v1  ;;  %v235_v11 = vadd.s32 %v234_v6, %v231_v4  ;;  %v219_v13 = vmul.f32 %v454_v7, %v212_v9  ;;  %v253_v16 = vld [vmem:[%s644_s2 + $0x40] sm:$0xff]  ;;  %v250_v20 = vld [vmem:[%s644_s2 + $0x28] sm:$0xff]  ;;  %v248_v24 = vld [vmem:[%s644_s2 + $0x18] sm:$0xff]  ;;  %v232_v25 = vadd.s32 8, %v231_v4 }
  0x10   : > { %483 = vmatprep.subr.mxu0 %v258_v3  ;;  %v213_v21 = vld [vmem:[%s200_s8 + $0x8] sm:$0xff]  ;;  %v249_v22 = vld [vmem:[%s644_s2 + $0x20] sm:$0xff]  ;;  %v247_v26 = vld [vmem:[%s644_s2 + $0x10] sm:$0xff] }
  0x11   : > { %484 = vmatpush3.msra.mxu0 %v258_v3  ;;  %v226_v15 = vadd.f32 %v455_v10, %v219_v13  ;;  %vm237_vm0 = vcmp.lt.s32.totalorder %v235_v11, 40  ;;  %v220_v23 = vmul.f32 %v454_v7, %v213_v21  ;;  %v246_v28 = vld [vmem:[%s644_s2 + $0x8] sm:$0xff]  ;;  %v236_v29 = vadd.s32 %v234_v6, %v232_v25  ;;  %v245_v30 = vld [vmem:[%s644_s2] sm:$0xff] }
  0x12   : > { %485 = vmatprep.subr.mxu0 %v257_v5 }
  0x13   : > { %486 = vmatpush3.msra.mxu0 %v257_v5  ;;  %v228_v17 = vmax.f32 %v226_v15, 0.0  ;;  %v227_v27 = vadd.f32 %v455_v10, %v220_v23  ;;  %vm238_vm1 = vcmp.lt.s32.totalorder %v236_v29, 40 }
  0x14   : > { %487 = vmatprep.subr.mxu0 %v256_v8 }
  0x15   : > { %488 = vmatpush3.msra.mxu0 %v256_v8  ;;  %511 = vmatprep.mubr.msk.f32.mxu0 %vm237_vm0, %v228_v17  ;;  %v229_v31 = vmax.f32 %v227_v27, 0.0 }
  0x16   : > { %489 = vmatprep.subr.mxu0 %v255_v12 }
  0x17   : > { %490 = vmatpush3.msra.mxu0 %v255_v12 }
  0x18   : > { %491 = vmatprep.subr.mxu0 %v254_v14 }
  0x19   : > { %492 = vmatpush3.msra.mxu0 %v254_v14 }
  0x1a   : > { %493 = vmatprep.subr.mxu0 %v253_v16 }
  0x1b   : > { %494 = vmatpush3.msra.mxu0 %v253_v16 }
  0x1c   : > { %495 = vmatprep.subr.mxu0 %v252_v18 }
  0x1d   : > { %496 = vmatpush3.msra.mxu0 %v252_v18 }
  0x1e   : > { %497 = vmatprep.subr.mxu0 %v251_v19 }
  0x1f   : > { %498 = vmatpush3.msra.mxu0 %v251_v19 }
  0x20   : > { %499 = vmatprep.subr.mxu0 %v250_v20 }
  0x21   : > { %500 = vmatpush3.msra.mxu0 %v250_v20 }
  0x22   : > { %501 = vmatprep.subr.mxu0 %v249_v22 }
  0x23   : > { %502 = vmatpush3.msra.mxu0 %v249_v22 }
  0x24   : > { %503 = vmatprep.subr.mxu0 %v248_v24 }
  0x25   : > { %504 = vmatpush3.msra.mxu0 %v248_v24 }
  0x26   : > { %505 = vmatprep.subr.mxu0 %v247_v26 }
  0x27   : > { %506 = vmatpush3.msra.mxu0 %v247_v26 }
  0x28   : > { %507 = vmatprep.subr.mxu0 %v246_v28 }
  0x29   : > { %508 = vmatpush3.msra.mxu0 %v246_v28 }
  0x2a   : > { %509 = vmatprep.subr.mxu0 %v245_v30 }
  0x2b   : > { %510 = vmatpush3.msra.mxu0 %v245_v30 }
  0x2c   : > { %512 = vmatmul.mubr.msk.f32.vlgmr.msra.gmra.mxu0 %vm238_vm1, %v229_v31 }
  0xec   : > { %v513_v32 = vpop.f32.mrf.mxu0 }
  0xed   : > { %v346_v34 = vmul.f32 %v513_v32, %v513_v32  ;;  %337 = vst [vmem:[%s206_s13 + $0x8] sm:$0xff] %v513_v32 }
  0xee   : > { %v327_v33 = vpop.f32.mrf.mxu0 }
  0xef   : > { %336 = vst [vmem:[%s206_s13] sm:$0xff] %v327_v33  ;;  %v338_v35 = vadd.f32 %v513_v32, %v327_v33  ;;  %v345_v36 = vmul.f32 %v327_v33, %v327_v33 }
  0xf1   : > { %v339_v37 = vrot.slane %v338_v35, 4  ;;  %v347_v38 = vadd.f32 %v346_v34, %v345_v36 }
  0xf3   : > { %v340_v39 = vadd.f32 %v339_v37, %v338_v35  ;;  %v348_v40 = vrot.slane %v347_v38, 4 }
  0xf5   : > { %v341_v41 = vrot.slane %v340_v39, 2  ;;  %v349_v42 = vadd.f32 %v348_v40, %v347_v38 }
  0xf7   : > { %v342_v43 = vadd.f32 %v341_v41, %v340_v39  ;;  %v350_v44 = vrot.slane %v349_v42, 2 }
  0xf9   : > { %v343_v45 = vrot.slane %v342_v43, 1  ;;  %v351_v46 = vadd.f32 %v350_v44, %v349_v42 }
  0xfb   : > { %v352_v47 = vrot.slane %v351_v46, 1  ;;  %v344_v48 = vadd.f32 %v343_v45, %v342_v43 }
  0xfd   : > { %v353_v49 = vadd.f32 %v352_v47, %v351_v46 }
  0xff   : > { %v355_v50 = vsel %vm354_vm2, %v344_v48, %v353_v49 }
 0x100   : > { %356 = vst [vmem:[%s211_s17] sm:$0x3] %v355_v50 }
 0x101 PF: > { %s15_s15 = sadd.s32 1, %s528_s15  }
 0x102   : > { %p12_p5 = scmp.ge.s32.totalorder %s15_s15, 5  }
 0x104   :  { %14 = sbr.rel (!%p12_p5) target bundleno = 1 (0x1), region = 74 }

// kernel: mlp_forward.4
= control target key start
LH: loop header
LB: loop body
LE: loop exit
PB: predicated region body
PF: predicated region fallthrough
CT: control target
= control target key end

     0   :  { %s487_s12 = smov 0   ;;  %s571_s0 = inlined_call_operand.vmem [shape: f32[48,128], index: 0, kind: input, shape index: {}]   ;;  %s572_s1 = inlined_call_operand.vmem [shape: f32[128,128], index: 1, kind: input, shape index: {}]   ;;  %s573_s2 = inlined_call_operand.vmem [shape: f32[48,128], index: 2, kind: output, shape index: {0}]   ;;  %s574_s3 = inlined_call_operand.vmem [shape: f32[3,2,128], index: 3, kind: output, shape index: {1}]  }
   0x1 LB: > { %s493_s13 = sadd.s32 4294967295, %s465_s12   ;;  %p390_p0 = scmp.ge.s32.totalorder %s465_s12, 1  ;;  %s465_s12 = sphi %s487_s12, %s14_s12  }
   0x2   : > { %p141_p1 = scmp.lt.s32.totalorder %s465_s12, 4 }
   0x4   : > { %p142_p2 = pnand %p390_p0, %p141_p1 }
   0x5   : > { %s391_s18 = sshll.u32 (!%p142_p2), %s493_s13, 1  ;;  %p181_p4 = scmp.lt.s32.totalorder (!%p142_p2), %s493_s13, 2 }
   0x6   : > { %145 = sbr.rel (%p142_p2) target bundleno = 257 (0x101), region = 28  ;;  %p170_p3 = scmp.lt.s32.totalorder (!%p142_p2), %s391_s18, 5 }
   0xb   : > { %v202_v0 = vld [vmem:[%s572_s1 + $0x78] sm:$0xff]  ;;  %v201_v1 = vld [vmem:[%s572_s1 + $0x70] sm:$0xff]  ;;  %v200_v2 = vld [vmem:[%s572_s1 + $0x68] sm:$0xff]  ;;  %s576_s18 = smov (!%p170_p3, %s391_s18), 5  ;;  %s578_s13 = smov (!%p181_p4, %s493_s13), 2  ;;  %vm296_vm0 = vcmask 1040384  }
   0xc   : > { %416 = vmatprep.subr.mxu0 %v202_v0  ;;  %v199_v3 = vld [vmem:[%s572_s1 + $0x60] sm:$0xff]  ;;  %s392_s23 = sshll.u32 %s576_s18, 3  ;;  %v198_v4 = vld [vmem:[%s572_s1 + $0x58] sm:$0xff]  ;;  %v197_v6 = vld [vmem:[%s572_s1 + $0x50] sm:$0xff]  ;;  %s395_s18 = sshll.u32 %s578_s13, 1 }
   0xd   : > { %417 = vmatpush3.msra.mxu0 %v202_v0  ;;  %s521_s28 = scalar_lea.vmem %s571_s0, %s392_s23  ;;  %v196_v7 = vld [vmem:[%s572_s1 + $0x48] sm:$0xff]  ;;  %v195_v8 = vld [vmem:[%s572_s1 + $0x40] sm:$0xff]  ;;  %v194_v9 = vld [vmem:[%s572_s1 + $0x38] sm:$0xff]  ;;  %s179_s4 = scalar_lea.vmem %s573_s2, %s392_s23 }
   0xe   : > { %418 = vmatprep.subr.mxu0 %v201_v1  ;;  %v185_v5 = vld [vmem:[%s521_s28] sm:$0xff]  ;;  %v193_v10 = vld [vmem:[%s572_s1 + $0x30] sm:$0xff]  ;;  %v192_v11 = vld [vmem:[%s572_s1 + $0x28] sm:$0xff]  ;;  %s184_s5 = scalar_lea.vmem %s574_s3, %s395_s18 }
   0xf   : > { %419 = vmatpush3.msra.mxu0 %v201_v1  ;;  %448 = vmatprep.mubr.f32.mxu0 %v185_v5  ;;  %v191_v12 = vld [vmem:[%s572_s1 + $0x20] sm:$0xff]  ;;  %v190_v13 = vld [vmem:[%s572_s1 + $0x18] sm:$0xff]  ;;  %v189_v14 = vld [vmem:[%s572_s1 + $0x10] sm:$0xff] }
  0x10   : > { %420 = vmatprep.subr.mxu0 %v200_v2  ;;  %v188_v15 = vld [vmem:[%s572_s1 + $0x8] sm:$0xff]  ;;  %v187_v16 = vld [vmem:[%s572_s1] sm:$0xff] }
  0x11   : > { %421 = vmatpush3.msra.mxu0 %v200_v2  ;;  %v186_v17 = vld [vmem:[%s521_s28 + $0x8] sm:$0xff] }
  0x12   : > { %422 = vmatprep.subr.mxu0 %v199_v3 }
  0x13   : > { %423 = vmatpush3.msra.mxu0 %v199_v3 }
  0x14   : > { %424 = vmatprep.subr.mxu0 %v198_v4 }
  0x15   : > { %425 = vmatpush3.msra.mxu0 %v198_v4 }
  0x16   : > { %426 = vmatprep.subr.mxu0 %v197_v6 }
  0x17   : > { %427 = vmatpush3.msra.mxu0 %v197_v6 }
  0x18   : > { %428 = vmatprep.subr.mxu0 %v196_v7 }
  0x19   : > { %429 = vmatpush3.msra.mxu0 %v196_v7 }
  0x1a   : > { %430 = vmatprep.subr.mxu0 %v195_v8 }
  0x1b   : > { %431 = vmatpush3.msra.mxu0 %v195_v8 }
  0x1c   : > { %432 = vmatprep.subr.mxu0 %v194_v9 }
  0x1d   : > { %433 = vmatpush3.msra.mxu0 %v194_v9 }
  0x1e   : > { %434 = vmatprep.subr.mxu0 %v193_v10 }
  0x1f   : > { %435 = vmatpush3.msra.mxu0 %v193_v10 }
  0x20   : > { %436 = vmatprep.subr.mxu0 %v192_v11 }
  0x21   : > { %437 = vmatpush3.msra.mxu0 %v192_v11 }
  0x22   : > { %438 = vmatprep.subr.mxu0 %v191_v12 }
  0x23   : > { %439 = vmatpush3.msra.mxu0 %v191_v12 }
  0x24   : > { %440 = vmatprep.subr.mxu0 %v190_v13 }
  0x25   : > { %441 = vmatpush3.msra.mxu0 %v190_v13 }
  0x26   : > { %442 = vmatprep.subr.mxu0 %v189_v14 }
  0x27   : > { %443 = vmatpush3.msra.mxu0 %v189_v14 }
  0x28   : > { %444 = vmatprep.subr.mxu0 %v188_v15 }
  0x29   : > { %445 = vmatpush3.msra.mxu0 %v188_v15 }
  0x2a   : > { %446 = vmatprep.subr.mxu0 %v187_v16 }
  0x2b   : > { %447 = vmatpush3.msra.mxu0 %v187_v16 }
  0x2c   : > { %449 = vmatmul.mubr.f32.vlgmr.msra.gmra.mxu0 %v186_v17 }
  0xec   : > { %v450_v18 = vpop.f32.mrf.mxu0 }
  0xed   : > { %v288_v20 = vmul.f32 %v450_v18, %v450_v18  ;;  %279 = vst [vmem:[%s179_s4 + $0x8] sm:$0xff] %v450_v18 }
  0xee   : > { %v269_v19 = vpop.f32.mrf.mxu0 }
  0xef   : > { %278 = vst [vmem:[%s179_s4] sm:$0xff] %v269_v19  ;;  %v280_v21 = vadd.f32 %v450_v18, %v269_v19  ;;  %v287_v22 = vmul.f32 %v269_v19, %v269_v19 }
  0xf1   : > { %v281_v23 = vrot.slane %v280_v21, 4  ;;  %v289_v24 = vadd.f32 %v288_v20, %v287_v22 }
  0xf3   : > { %v282_v25 = vadd.f32 %v281_v23, %v280_v21  ;;  %v290_v26 = vrot.slane %v289_v24, 4 }
  0xf5   : > { %v283_v27 = vrot.slane %v282_v25, 2  ;;  %v291_v28 = vadd.f32 %v290_v26, %v289_v24 }
  0xf7   : > { %v284_v29 = vadd.f32 %v283_v27, %v282_v25  ;;  %v292_v30 = vrot.slane %v291_v28, 2 }
  0xf9   : > { %v285_v31 = vrot.slane %v284_v29, 1  ;;  %v293_v32 = vadd.f32 %v292_v30, %v291_v28 }
  0xfb   : > { %v294_v33 = vrot.slane %v293_v32, 1  ;;  %v286_v34 = vadd.f32 %v285_v31, %v284_v29 }
  0xfd   : > { %v295_v35 = vadd.f32 %v294_v33, %v293_v32 }
  0xff   : > { %v297_v36 = vsel %vm296_vm0, %v286_v34, %v295_v35 }
 0x100   : > { %298 = vst [vmem:[%s184_s5] sm:$0x3] %v297_v36 }
 0x101 PF: > { %s14_s12 = sadd.s32 1, %s465_s12  }
 0x102   : > { %p11_p5 = scmp.ge.s32.totalorder %s14_s12, 5  }
 0x104   :  { %13 = sbr.rel (!%p11_p5) target bundleno = 1 (0x1), region = 70 }

</bundles_post_ra>
